<compile_context>
chip_gen: v5e
topology: v5e:2x2
jax: 0.10.0
libtpu: 0.0.40
codegen_flags: <defaults>
</compile_context>

<pallas_src>
import functools

import jax
import jax.numpy as jnp
from jax import lax
from jax.experimental import pallas as pl
from jax.experimental.pallas import tpu as pltpu


def _idsc_kernel(x_ref, pww_ref, pwb_ref, dww_ref, dwb_ref, o_ref,
                 *, N, H, W, Cin, Cout):
    # x_ref:   (N*H, W*Cin)    lane-dense input rows
    # pww_ref: (W*Cin, W*Cout) block-diagonal pointwise weight kron(I_W, pw_w)
    # pwb_ref: (1, W*Cout)     pointwise bias, tiled over W
    # dww_ref: (9, W*Cout)     depthwise taps (kh*3+kw), tiled over W
    # dwb_ref: (1, W*Cout)     depthwise bias, tiled over W
    # o_ref:   (N*H, W*Cout)
    NH = N * H
    WC = W * Cout

    # ---- pointwise 1x1 conv: one lane-dense MXU matmul ---------------------
    x = x_ref[...]                                           # (NH, W*Cin)
    mid = jnp.dot(x, pww_ref[...], preferred_element_type=jnp.float32)
    mid = mid + pwb_ref[...]                                 # (NH, WC), in vregs

    # ---- hoisted constants: tap weights + border masks ---------------------
    dw_all = dww_ref[...]                                    # (9, WC) loaded once
    row = lax.broadcasted_iota(jnp.int32, (NH, WC), 0)
    lane = lax.broadcasted_iota(jnp.int32, (NH, WC), 1)
    h_idx = row % H                                          # row within image
    valid_h_m1 = h_idx >= 1                                  # tap h-1 exists
    valid_h_p1 = h_idx <= H - 2                              # tap h+1 exists
    valid_w_m1 = lane >= Cout                                # tap w-1 exists
    valid_w_p1 = lane < (W - 1) * Cout                       # tap w+1 exists

    zero = jnp.zeros_like(mid)
    zrow = jnp.zeros((1, WC), mid.dtype)

    # ---- depthwise 3x3, stride 1, padding 1 -- all in registers ------------
    acc = jnp.zeros_like(mid)
    for dh in (-1, 0, 1):
        if dh == 0:
            tap_h = mid
        elif dh == -1:
            # tap_h[r] = mid[r-1]; mask rows at the top border of each image
            shifted = jnp.concatenate([zrow, mid[:NH - 1, :]], axis=0)
            tap_h = jnp.where(valid_h_m1, shifted, zero)
        else:
            # tap_h[r] = mid[r+1]; mask rows at the bottom border of each image
            shifted = jnp.concatenate([mid[1:, :], zrow], axis=0)
            tap_h = jnp.where(valid_h_p1, shifted, zero)
        for dw in (-1, 0, 1):
            if dw == 0:
                tap = tap_h
            else:
                # shift by one pixel in W == lane roll by Cout, mask the wrap
                rolled = pltpu.roll(tap_h, (-dw * Cout) % WC, 1)
                mask = valid_w_m1 if dw == -1 else valid_w_p1
                tap = jnp.where(mask, rolled, zero)
            k = (dh + 1) * 3 + (dw + 1)                      # tap index 0..8
            acc = acc + tap * dw_all[k:k + 1, :]             # (1, WC) broadcast

    acc = acc + dwb_ref[...]
    o_ref[...] = acc.astype(o_ref.dtype)                     # unmasked full-lane store


def idsc_pallas(x_nhwc, pw_w, pw_b, dw_w, dw_b):
    """x_nhwc: (N,H,W,Cin); pw_w: (Cin,Cout); pw_b: (Cout,);
       dw_w: (3,3,Cout) [kh,kw,o]; dw_b: (Cout,)."""
    N, H, W, Cin = x_nhwc.shape
    Cout = pw_w.shape[1]
    NH, WCi, WCo = N * H, W * Cin, W * Cout

    # Layout plumbing / weight prep only (no per-pixel FLOPs):
    x2d = x_nhwc.reshape(NH, WCi)                            # rows=(n,h), lanes=(w,c)
    pww = jnp.kron(jnp.eye(W, dtype=pw_w.dtype), pw_w)       # (WCi, WCo) block-diag
    pwb = jnp.tile(pw_b.reshape(1, Cout), (1, W))            # (1, WCo)
    dww = jnp.tile(dw_w.reshape(9, Cout), (1, W))            # (9, WCo)
    dwb = jnp.tile(dw_b.reshape(1, Cout), (1, W))            # (1, WCo)

    kernel = functools.partial(_idsc_kernel, N=N, H=H, W=W, Cin=Cin, Cout=Cout)

    grid_spec = pltpu.PrefetchScalarGridSpec(
        num_scalar_prefetch=0,
        grid=(1,),                                           # batch folded into rows
        in_specs=[
            pl.BlockSpec((NH, WCi), lambda i: (0, 0)),
            pl.BlockSpec((WCi, WCo), lambda i: (0, 0)),
            pl.BlockSpec((1, WCo), lambda i: (0, 0)),
            pl.BlockSpec((9, WCo), lambda i: (0, 0)),
            pl.BlockSpec((1, WCo), lambda i: (0, 0)),
        ],
        out_specs=pl.BlockSpec((NH, WCo), lambda i: (0, 0)),
    )

    out2d = pl.pallas_call(
        kernel,
        out_shape=jax.ShapeDtypeStruct((NH, WCo), x_nhwc.dtype),
        grid_spec=grid_spec,
        compiler_params=pltpu.CompilerParams(
            dimension_semantics=("arbitrary",)),
    )(x2d, pww, pwb, dww, dwb)

    return out2d.reshape(N, H, W, Cout)


def idsc_reference(x_nhwc, pw_w, pw_b, dw_w, dw_b):
    """Pure-JAX reference (matches PyTorch IDSC.forward semantics, NHWC)."""
    Cout = pw_w.shape[1]
    mid = jnp.einsum("nhwc,co->nhwo", x_nhwc, pw_w) + pw_b
    dw_hwio = dw_w.reshape(3, 3, 1, Cout)                    # HWIO with I=1 (grouped)
    out = lax.conv_general_dilated(
        mid, dw_hwio, window_strides=(1, 1), padding=((1, 1), (1, 1)),
        dimension_numbers=("NHWC", "HWIO", "NHWC"),
        feature_group_count=Cout)
    return out + dw_b


if __name__ == "__main__":
    # Small shapes consistent with the module: batch=2, c_in=4, c_out=8, 16x16.
    N, Cin, Cout, H, W = 2, 4, 8, 16, 16

    key = jax.random.PRNGKey(0)
    kx, kpw, kpb, kdw, kdb = jax.random.split(key, 5)

    # Input in PyTorch NCHW, converted to NHWC for the kernel.
    x_nchw = jax.random.normal(kx, (N, Cin, H, W), dtype=jnp.float32)
    x_nhwc = jnp.transpose(x_nchw, (0, 2, 3, 1))

    # Parameter shapes from nn.Conv2d in __init__:
    # pw: weight (Cout, Cin, 1, 1) -> (Cin, Cout); dw: (Cout, 1, 3, 3) -> (3,3,Cout)
    pw_w = 0.1 * jax.random.normal(kpw, (Cin, Cout), dtype=jnp.float32)
    pw_b = 0.1 * jax.random.normal(kpb, (Cout,), dtype=jnp.float32)
    dw_w = 0.1 * jax.random.normal(kdw, (3, 3, Cout), dtype=jnp.float32)
    dw_b = 0.1 * jax.random.normal(kdb, (Cout,), dtype=jnp.float32)

    out = idsc_pallas(x_nhwc, pw_w, pw_b, dw_w, dw_b)
    out = jax.block_until_ready(out)

    ref = idsc_reference(x_nhwc, pw_w, pw_b, dw_w, dw_b)
    assert out.shape == (N, H, W, Cout), out.shape
    assert jnp.allclose(out, ref, atol=1e-5, rtol=1e-5), \
        float(jnp.max(jnp.abs(out - ref)))

    print("KERNEL_OK")
</pallas_src>

<mosaic_0001>
module attributes {stable_mosaic.version = 11 : i64} {
  func.func @_idsc_kernel(%arg0: i32, %arg1: memref<32x64xf32, #tpu.memory_space<vmem>>, %arg2: memref<64x128xf32, #tpu.memory_space<vmem>>, %arg3: memref<1x128xf32, #tpu.memory_space<vmem>>, %arg4: memref<9x128xf32, #tpu.memory_space<vmem>>, %arg5: memref<1x128xf32, #tpu.memory_space<vmem>>, %arg6: memref<32x128xf32, #tpu.memory_space<vmem>>) attributes {dimension_semantics = [#tpu.dimension_semantics<arbitrary>], iteration_bounds = array<i64: 1>, scalar_prefetch = 0 : i64, scratch_operands = 0 : i64, tpu.core_type = #tpu.core_type<tc>, window_params = [{pipeline_mode = #tpu.pipeline_mode<synchronous>, transform_indices = @transform_0, window_bounds = array<i64: 32, 64>}, {pipeline_mode = #tpu.pipeline_mode<synchronous>, transform_indices = @transform_1, window_bounds = array<i64: 64, 128>}, {pipeline_mode = #tpu.pipeline_mode<synchronous>, transform_indices = @transform_2, window_bounds = array<i64: 1, 128>}, {pipeline_mode = #tpu.pipeline_mode<synchronous>, transform_indices = @transform_3, window_bounds = array<i64: 9, 128>}, {pipeline_mode = #tpu.pipeline_mode<synchronous>, transform_indices = @transform_4, window_bounds = array<i64: 1, 128>}, {pipeline_mode = #tpu.pipeline_mode<synchronous>, transform_indices = @transform_5, window_bounds = array<i64: 32, 128>}]} {
    %c0 = arith.constant 0 : index
    %c0_0 = arith.constant 0 : index
    %0 = vector.load %arg1[%c0, %c0_0] : memref<32x64xf32, #tpu.memory_space<vmem>>, vector<32x64xf32>
    %c0_1 = arith.constant 0 : index
    %c0_2 = arith.constant 0 : index
    %1 = vector.load %arg2[%c0_1, %c0_2] : memref<64x128xf32, #tpu.memory_space<vmem>>, vector<64x128xf32>
    %cst = arith.constant dense<0.000000e+00> : vector<32x128xf32>
    %2 = tpu.matmul %0, %1, %cst {dimension_numbers = #tpu.dot_dimension_numbers<[1], [0], [0], [1], [0, 0, 1, 1], [], []>} : vector<32x64xf32>, vector<64x128xf32>, vector<32x128xf32> -> vector<32x128xf32>
    %c0_3 = arith.constant 0 : index
    %c0_4 = arith.constant 0 : index
    %3 = vector.load %arg3[%c0_3, %c0_4] : memref<1x128xf32, #tpu.memory_space<vmem>>, vector<1x128xf32>
    %4 = vector.broadcast %3 : vector<1x128xf32> to vector<32x128xf32>
    %5 = arith.addf %2, %4 : vector<32x128xf32>
    %c0_5 = arith.constant 0 : index
    %c0_6 = arith.constant 0 : index
    %6 = vector.load %arg4[%c0_5, %c0_6] : memref<9x128xf32, #tpu.memory_space<vmem>>, vector<9x128xf32>
    %7 = tpu.iota {dimensions = array<i32: 0>} : vector<32x128xi32>
    %8 = tpu.iota {dimensions = array<i32: 1>} : vector<32x128xi32>
    %c16_i32 = arith.constant 16 : i32
    %c0_i32 = arith.constant 0 : i32
    %9 = arith.cmpi eq, %c16_i32, %c0_i32 : i32
    %c1_i32 = arith.constant 1 : i32
    %10 = arith.select %9, %c1_i32, %c16_i32 : i32
    %11 = vector.broadcast %10 : i32 to vector<32x128xi32>
    %12 = arith.remsi %7, %11 : vector<32x128xi32>
    %c0_i32_7 = arith.constant 0 : i32
    %13 = vector.broadcast %c0_i32_7 : i32 to vector<32x128xi32>
    %14 = arith.cmpi ne, %12, %13 : vector<32x128xi32>
    %c0_i32_8 = arith.constant 0 : i32
    %15 = vector.broadcast %c0_i32_8 : i32 to vector<32x128xi32>
    %16 = arith.cmpi slt, %12, %15 : vector<32x128xi32>
    %c0_i32_9 = arith.constant 0 : i32
    %17 = arith.cmpi slt, %10, %c0_i32_9 : i32
    %18 = vector.broadcast %17 : i1 to vector<32x128xi1>
    %19 = vector.broadcast %18 : vector<32x128xi1> to vector<32x128xi1>
    %20 = arith.xori %16, %19 : vector<32x128xi1>
    %21 = arith.andi %20, %14 : vector<32x128xi1>
    %22 = vector.broadcast %10 : i32 to vector<32x128xi32>
    %23 = arith.addi %12, %22 : vector<32x128xi32>
    %24 = arith.select %21, %23, %12 : vector<32x128xi1>, vector<32x128xi32>
    %c1_i32_10 = arith.constant 1 : i32
    %25 = vector.broadcast %c1_i32_10 : i32 to vector<32x128xi32>
    %26 = arith.cmpi sge, %24, %25 : vector<32x128xi32>
    %c14_i32 = arith.constant 14 : i32
    %27 = vector.broadcast %c14_i32 : i32 to vector<32x128xi32>
    %28 = arith.cmpi sle, %24, %27 : vector<32x128xi32>
    %c8_i32 = arith.constant 8 : i32
    %29 = vector.broadcast %c8_i32 : i32 to vector<32x128xi32>
    %30 = arith.cmpi sge, %8, %29 : vector<32x128xi32>
    %c120_i32 = arith.constant 120 : i32
    %31 = vector.broadcast %c120_i32 : i32 to vector<32x128xi32>
    %32 = arith.cmpi slt, %8, %31 : vector<32x128xi32>
    %cst_11 = arith.constant 0.000000e+00 : f32
    %33 = vector.broadcast %cst_11 : f32 to vector<32x128xf32>
    %cst_12 = arith.constant 0.000000e+00 : f32
    %34 = vector.broadcast %cst_12 : f32 to vector<1x128xf32>
    %cst_13 = arith.constant 0.000000e+00 : f32
    %35 = vector.broadcast %cst_13 : f32 to vector<32x128xf32>
    %36 = vector.extract_strided_slice %5 {offsets = [0, 0], sizes = [31, 128], strides = [1, 1]} : vector<32x128xf32> to vector<31x128xf32>
    %37 = tpu.concatenate %34, %36 in 0 : vector<1x128xf32>, vector<31x128xf32> -> vector<32x128xf32>
    %38 = arith.select %26, %37, %33 : vector<32x128xi1>, vector<32x128xf32>
    %c8_i32_14 = arith.constant 8 : i32
    %39 = tpu.dynamic_rotate %38 by %c8_i32_14 dim 1 : vector<32x128xf32>, i32 -> vector<32x128xf32>
    %40 = arith.select %30, %39, %33 : vector<32x128xi1>, vector<32x128xf32>
    %41 = vector.extract_strided_slice %6 {offsets = [0, 0], sizes = [1, 128], strides = [1, 1]} : vector<9x128xf32> to vector<1x128xf32>
    %42 = vector.broadcast %41 : vector<1x128xf32> to vector<32x128xf32>
    %43 = arith.mulf %40, %42 : vector<32x128xf32>
    %44 = arith.addf %35, %43 : vector<32x128xf32>
    %45 = vector.extract_strided_slice %6 {offsets = [1, 0], sizes = [1, 128], strides = [1, 1]} : vector<9x128xf32> to vector<1x128xf32>
    %46 = vector.broadcast %45 : vector<1x128xf32> to vector<32x128xf32>
    %47 = arith.mulf %38, %46 : vector<32x128xf32>
    %48 = arith.addf %44, %47 : vector<32x128xf32>
    %c120_i32_15 = arith.constant 120 : i32
    %49 = tpu.dynamic_rotate %38 by %c120_i32_15 dim 1 : vector<32x128xf32>, i32 -> vector<32x128xf32>
    %50 = arith.select %32, %49, %33 : vector<32x128xi1>, vector<32x128xf32>
    %51 = vector.extract_strided_slice %6 {offsets = [2, 0], sizes = [1, 128], strides = [1, 1]} : vector<9x128xf32> to vector<1x128xf32>
    %52 = vector.broadcast %51 : vector<1x128xf32> to vector<32x128xf32>
    %53 = arith.mulf %50, %52 : vector<32x128xf32>
    %54 = arith.addf %48, %53 : vector<32x128xf32>
    %c8_i32_16 = arith.constant 8 : i32
    %55 = tpu.dynamic_rotate %5 by %c8_i32_16 dim 1 : vector<32x128xf32>, i32 -> vector<32x128xf32>
    %56 = arith.select %30, %55, %33 : vector<32x128xi1>, vector<32x128xf32>
    %57 = vector.extract_strided_slice %6 {offsets = [3, 0], sizes = [1, 128], strides = [1, 1]} : vector<9x128xf32> to vector<1x128xf32>
    %58 = vector.broadcast %57 : vector<1x128xf32> to vector<32x128xf32>
    %59 = arith.mulf %56, %58 : vector<32x128xf32>
    %60 = arith.addf %54, %59 : vector<32x128xf32>
    %61 = vector.extract_strided_slice %6 {offsets = [4, 0], sizes = [1, 128], strides = [1, 1]} : vector<9x128xf32> to vector<1x128xf32>
    %62 = vector.broadcast %61 : vector<1x128xf32> to vector<32x128xf32>
    %63 = arith.mulf %5, %62 : vector<32x128xf32>
    %64 = arith.addf %60, %63 : vector<32x128xf32>
    %c120_i32_17 = arith.constant 120 : i32
    %65 = tpu.dynamic_rotate %5 by %c120_i32_17 dim 1 : vector<32x128xf32>, i32 -> vector<32x128xf32>
    %66 = arith.select %32, %65, %33 : vector<32x128xi1>, vector<32x128xf32>
    %67 = vector.extract_strided_slice %6 {offsets = [5, 0], sizes = [1, 128], strides = [1, 1]} : vector<9x128xf32> to vector<1x128xf32>
    %68 = vector.broadcast %67 : vector<1x128xf32> to vector<32x128xf32>
    %69 = arith.mulf %66, %68 : vector<32x128xf32>
    %70 = arith.addf %64, %69 : vector<32x128xf32>
    %71 = vector.extract_strided_slice %5 {offsets = [1, 0], sizes = [31, 128], strides = [1, 1]} : vector<32x128xf32> to vector<31x128xf32>
    %72 = tpu.concatenate %71, %34 in 0 : vector<31x128xf32>, vector<1x128xf32> -> vector<32x128xf32>
    %73 = arith.select %28, %72, %33 : vector<32x128xi1>, vector<32x128xf32>
    %c8_i32_18 = arith.constant 8 : i32
    %74 = tpu.dynamic_rotate %73 by %c8_i32_18 dim 1 : vector<32x128xf32>, i32 -> vector<32x128xf32>
    %75 = arith.select %30, %74, %33 : vector<32x128xi1>, vector<32x128xf32>
    %76 = vector.extract_strided_slice %6 {offsets = [6, 0], sizes = [1, 128], strides = [1, 1]} : vector<9x128xf32> to vector<1x128xf32>
    %77 = vector.broadcast %76 : vector<1x128xf32> to vector<32x128xf32>
    %78 = arith.mulf %75, %77 : vector<32x128xf32>
    %79 = arith.addf %70, %78 : vector<32x128xf32>
    %80 = vector.extract_strided_slice %6 {offsets = [7, 0], sizes = [1, 128], strides = [1, 1]} : vector<9x128xf32> to vector<1x128xf32>
    %81 = vector.broadcast %80 : vector<1x128xf32> to vector<32x128xf32>
    %82 = arith.mulf %73, %81 : vector<32x128xf32>
    %83 = arith.addf %79, %82 : vector<32x128xf32>
    %c120_i32_19 = arith.constant 120 : i32
    %84 = tpu.dynamic_rotate %73 by %c120_i32_19 dim 1 : vector<32x128xf32>, i32 -> vector<32x128xf32>
    %85 = arith.select %32, %84, %33 : vector<32x128xi1>, vector<32x128xf32>
    %86 = vector.extract_strided_slice %6 {offsets = [8, 0], sizes = [1, 128], strides = [1, 1]} : vector<9x128xf32> to vector<1x128xf32>
    %87 = vector.broadcast %86 : vector<1x128xf32> to vector<32x128xf32>
    %88 = arith.mulf %85, %87 : vector<32x128xf32>
    %89 = arith.addf %83, %88 : vector<32x128xf32>
    %c0_20 = arith.constant 0 : index
    %c0_21 = arith.constant 0 : index
    %90 = vector.load %arg5[%c0_20, %c0_21] : memref<1x128xf32, #tpu.memory_space<vmem>>, vector<1x128xf32>
    %91 = vector.broadcast %90 : vector<1x128xf32> to vector<32x128xf32>
    %92 = arith.addf %89, %91 : vector<32x128xf32>
    %c0_22 = arith.constant 0 : index
    %c0_23 = arith.constant 0 : index
    %93 = vector.load %arg6[%c0_22, %c0_23] : memref<32x128xf32, #tpu.memory_space<vmem>>, vector<32x128xf32>
    tpu.vector_store %arg6[%c0_22, %c0_23], %92 {strides = array<i32>} : memref<32x128xf32, #tpu.memory_space<vmem>>, vector<32x128xf32>,
    return
  }
  func.func @transform_0(%arg0: i32) -> (i32, i32) {
    %c0_i32 = arith.constant 0 : i32
    %c0_i32_0 = arith.constant 0 : i32
    %c0_i32_1 = arith.constant 0 : i32
    return %c0_i32, %c0_i32_0 : i32, i32
  }
  func.func @transform_1(%arg0: i32) -> (i32, i32) {
    %c0_i32 = arith.constant 0 : i32
    %c0_i32_0 = arith.constant 0 : i32
    %c0_i32_1 = arith.constant 0 : i32
    return %c0_i32, %c0_i32_0 : i32, i32
  }
  func.func @transform_2(%arg0: i32) -> (i32, i32) {
    %c0_i32 = arith.constant 0 : i32
    %c0_i32_0 = arith.constant 0 : i32
    %c0_i32_1 = arith.constant 0 : i32
    return %c0_i32, %c0_i32_0 : i32, i32
  }
  func.func @transform_3(%arg0: i32) -> (i32, i32) {
    %c0_i32 = arith.constant 0 : i32
    %c0_i32_0 = arith.constant 0 : i32
    %c0_i32_1 = arith.constant 0 : i32
    return %c0_i32, %c0_i32_0 : i32, i32
  }
  func.func @transform_4(%arg0: i32) -> (i32, i32) {
    %c0_i32 = arith.constant 0 : i32
    %c0_i32_0 = arith.constant 0 : i32
    %c0_i32_1 = arith.constant 0 : i32
    return %c0_i32, %c0_i32_0 : i32, i32
  }
  func.func @transform_5(%arg0: i32) -> (i32, i32) {
    %c0_i32 = arith.constant 0 : i32
    %c0_i32_0 = arith.constant 0 : i32
    %c0_i32_1 = arith.constant 0 : i32
    return %c0_i32, %c0_i32_0 : i32, i32
  }
}

</mosaic_0001>

<bundles_post_ra>
// kernel: tpu_custom_call.1
= control target key start
LH: loop header
LB: loop body
LE: loop exit
PB: predicated region body
PF: predicated region fallthrough
CT: control target
= control target key end

     0   :  { %10 = vsyncpa [#allocation3], 0  ;;  %s834_s0 = inlined_call_operand.hbm [shape: f32[32,64], index: 0, kind: input, shape index: {}]   ;;  %s835_s1 = inlined_call_operand.hbm [shape: f32[64,128], index: 1, kind: input, shape index: {}]   ;;  %s836_s2 = inlined_call_operand.vmem [shape: f32[1,128], index: 2, kind: input, shape index: {}]   ;;  %s837_s3 = inlined_call_operand.hbm [shape: f32[9,128], index: 3, kind: input, shape index: {}]   ;;  %s838_s4 = inlined_call_operand.vmem [shape: f32[1,128], index: 4, kind: input, shape index: {}]   ;;  %s839_s5 = inlined_call_operand.hbm [shape: f32[32,128], index: 5, kind: output, shape index: {}]  }
   0x1   :  { %11 = vsyncpa [#allocation6], 0 }
   0x2   :  { %12 = vsyncpa [#allocation4], 0  ;;  %s30_s20 = sshll.u32 %s835_s1, 4  ;;  %s556_s21 = smov [#allocation5]   ;;  %s31_s20 = int_to_ptr.hbm [resolvable:$true] %s30_s20 }
   0x3   :  { %s32_s22 = sshll.u32 %s556_s21, 4  ;;  %s17_s25 = sshll.u32 %s834_s0, 4  ;;  %s33_s22 = int_to_ptr.vmem [resolvable:$true] %s32_s22  ;;  %s18_s25 = int_to_ptr.hbm [resolvable:$true] %s17_s25 }
   0x4   :  { %s557_s26 = smov 128   ;;  %s558_s27 = smov 8  }
   0x5   :  { %38 = dma.hbm_to_vmem [thread:$0]  %s31_s20, 1024, %s33_s22, [#allocation6], %s557_s26, %s557_s26, %s558_s27  }
   0x6   :  { %s559_s28 = smov [#allocation2]   ;;  %s45_s1 = sshll.u32 %s837_s3, 4  ;;  %s46_s1 = int_to_ptr.hbm [resolvable:$true] %s45_s1 }
   0x7   :  { %s19_s29 = sshll.u32 %s559_s28, 4  ;;  %s560_s0 = smov [#allocation7]   ;;  %s20_s29 = int_to_ptr.vmem [resolvable:$true] %s19_s29 }
   0x8   :  { %25 = dma.hbm_to_vmem [thread:$0]  %s18_s25, 512, %s20_s29, [#allocation3], %s557_s26, %s557_s26, %s558_s27  }
   0x9   :  { %s47_s7 = sshll.u32 %s560_s0, 4  ;;  %s48_s7 = int_to_ptr.vmem [resolvable:$true] %s47_s7 }
   0xa   :  { %53 = dma.hbm_to_vmem [thread:$0]  %s46_s1, 256, %s48_s7, [#allocation6], %s557_s26, %s557_s26, %s558_s27  }
   0xb   :  { %550 = dma.done.wait [#allocation3], 512  }
   0xc   :  { %551 = vsyncadd [#allocation3], 4294966784 }
   0xd   :  { %552 = dma.done.wait [#allocation6], 1280  }
   0xe   :  { %553 = vsyncadd [#allocation6], 4294966016  ;;  %v79_v0 = vld [vmem:[#allocation5 + $0x38] sm:$0xff]  ;;  %v78_v1 = vld [vmem:[#allocation5 + $0x30] sm:$0xff]  ;;  %vm84_vm0 = vcmask 523264   ;;  %v128_v17 = vlaneseq  ;;  %s561_s9 = smov 120  }
   0xf   :  { %105 = vmatpush.msra.mxu0 %v79_v0  ;;  %420 = vmatpush.msra.mxu1 %v79_v0  ;;  %v77_v2 = vld [vmem:[#allocation5 + $0x28] sm:$0xff]  ;;  %v76_v3 = vld [vmem:[#allocation5 + $0x20] sm:$0xff]  ;;  %v75_v4 = vld [vmem:[#allocation5 + $0x18] sm:$0xff]  ;;  %vm197_vm1 = vcmask 1040384   ;;  %vm316_vm2 = vcmask 1046528   ;;  %s402_s14 = sshll.u32 %s839_s5, 4  ;;  %s403_s14 = int_to_ptr.hbm [resolvable:$true] %s402_s14 }
  0x10   :  { %421 = vmatpush.msra.mxu2 %v79_v0  ;;  %422 = vmatpush.msra.mxu3 %v79_v0  ;;  %v74_v5 = vld [vmem:[#allocation5 + $0x10] sm:$0xff]  ;;  %v73_v6 = vld [vmem:[#allocation5 + $0x8] sm:$0xff]  ;;  %v72_v7 = vld [vmem:[#allocation5] sm:$0xff]  ;;  %v129_v22 = vshrl.u32 %v128_v17, 7  ;;  %v706_v59 = vand.u32 127, %v128_v17 }
  0x11   :  { %106 = vmatpush.msra.mxu0 %v78_v1  ;;  %423 = vmatpush.msra.mxu1 %v78_v1  ;;  %v68_v8 = vld [vmem:[#allocation2] sm:$0xff]  ;;  %v69_v9 = vld [vmem:[#allocation2 + $0x8] sm:$0xff]  ;;  %v70_v10 = vld [vmem:[#allocation2 + $0x10] sm:$0xff] }
  0x12   :  { %424 = vmatpush.msra.mxu2 %v78_v1  ;;  %425 = vmatpush.msra.mxu3 %v78_v1  ;;  %v71_v11 = vld [vmem:[#allocation2 + $0x18] sm:$0xff]  ;;  %v451_v12 = vld [vmem:[%s836_s2] ss:$0 sm:$0xff]  ;;  %v139_v25 = vand.u32 15, %v129_v22  ;;  %v131_v35 = vadd.s32 16, %v129_v22  ;;  %v130_v37 = vadd.s32 8, %v129_v22 }
  0x13   :  { %107 = vmatpush.msra.mxu0 %v77_v2  ;;  %426 = vmatpush.msra.mxu1 %v77_v2  ;;  %v132_v39 = vadd.s32 24, %v129_v22  ;;  %v126_v60 = vld [vmem:[#allocation7] sm:$0xff]  ;;  %vm192_vm7 = vcmp.lt.s32.totalorder %v706_v59, 120  ;;  %vm191_vm8 = vcmp.ge.s32.totalorder %v706_v59, 8 }
  0x14   :  { %427 = vmatpush.msra.mxu2 %v77_v2  ;;  %428 = vmatpush.msra.mxu3 %v77_v2  ;;  %vm183_vm3 = vcmp.ge.s32.totalorder %v139_v25, 1  ;;  %v153_v36 = vand.u32 15, %v131_v35  ;;  %v146_v41 = vand.u32 15, %v130_v37  ;;  %v708_v61 = vperm.slane %v126_v60, 1 }
  0x15   :  { %108 = vmatpush.msra.mxu0 %v76_v3  ;;  %429 = vmatpush.msra.mxu1 %v76_v3  ;;  %v160_v43 = vand.u32 15, %v132_v39  ;;  %v711_v62 = vperm.slane %v126_v60, 0  ;;  %v714_v0 = vperm.slane %v126_v60, 2 }
  0x16   :  { %430 = vmatpush.msra.mxu2 %v76_v3  ;;  %431 = vmatpush.msra.mxu3 %v76_v3  ;;  %vm185_vm4 = vcmp.ge.s32.totalorder %v153_v36, 1  ;;  %vm188_vm5 = vcmp.le.s32.totalorder %v146_v41, 14  ;;  %v756_v36 = vperm.slane %v126_v60, 7 }
  0x17   :  { %109 = vmatpush.msra.mxu0 %v75_v4  ;;  %432 = vmatpush.msra.mxu1 %v75_v4  ;;  %vm190_vm6 = vcmp.le.s32.totalorder %v160_v43, 14 }
  0x18   :  { %433 = vmatpush.msra.mxu2 %v75_v4  ;;  %434 = vmatpush.msra.mxu3 %v75_v4 }
  0x19   :  { %110 = vmatpush.msra.mxu0 %v74_v5  ;;  %435 = vmatpush.msra.mxu1 %v74_v5 }
  0x1a   :  { %436 = vmatpush.msra.mxu2 %v74_v5  ;;  %437 = vmatpush.msra.mxu3 %v74_v5 }
  0x1b   :  { %111 = vmatpush.msra.mxu0 %v73_v6  ;;  %438 = vmatpush.msra.mxu1 %v73_v6 }
  0x1c   :  { %439 = vmatpush.msra.mxu2 %v73_v6  ;;  %440 = vmatpush.msra.mxu3 %v73_v6 }
  0x1d   :  { %112 = vmatpush.msra.mxu0 %v72_v7  ;;  %441 = vmatpush.msra.mxu1 %v72_v7 }
  0x1e   :  { %442 = vmatpush.msra.mxu2 %v72_v7  ;;  %416 = vmatmul.msk.f32.vlgmr.msra.gmra.mxu0 %vm84_vm0, %v68_v8  ;;  %v727_v8 = vperm.slane %v126_v60, 4 }
  0x1f   :  { %417 = vmatmul.msk.f32.vlgmr.msra.gmra.mxu1 %vm84_vm0, %v69_v9  ;;  %418 = vmatmul.msk.f32.vlgmr.msra.gmra.mxu2 %vm84_vm0, %v70_v10  ;;  %v729_v9 = vperm.slane %v126_v60, 3 }
  0x20   :  { %443 = vmatpush.msra.mxu3 %v72_v7 }
  0x21   :  { %419 = vmatmul.msk.f32.vlgmr.msra.gmra.mxu3 %vm84_vm0, %v71_v11 }
  0x9b   :  { %v114_v13 = vpop.f32.mrf.mxu0 }
  0x9c   :  { %v614_v14 = vadd.f32 %v451_v12, %v114_v13  ;;  %v117_v15 = vpop.f32.mrf.mxu1 }
  0x9d   :  { %v616_v16 = vadd.f32 %v451_v12, %v117_v15 }
  0x9e   :  { %265 = vrot.lane.b32.xlu2 %v614_v14, %s558_s27  ;;  %v198_v18 = vrot.slane %v614_v14, 7  ;;  %v317_v20 = vrot.slane %v614_v14, 1 }
  0x9f   :  { %297 = vrot.lane.b32.xlu1 %v616_v16, %s561_s9  ;;  %267 = vrot.lane.b32.xlu0 %v616_v16, %s558_s27  ;;  %v199_v19 = vrot.slane %v616_v16, 7  ;;  %v318_v21 = vrot.slane %v616_v16, 1 }
  0xa0   :  { %v209_v27 = vsel %vm197_vm1, 0.0, %v198_v18 }
  0xa1   :  { %v630_v23 = vsel %vm197_vm1, %v198_v18, %v199_v19  ;;  %v633_v24 = vsel %vm316_vm2, %v317_v20, %v318_v21  ;;  %v644_v30 = vsel %vm183_vm3, %v209_v27, 0.0  ;;  %v288_v18 = vmul.f32 %v727_v8, %v616_v16 }
  0xa2   :  { %v120_v26 = vpop.f32.mrf.mxu2  ;;  %v237_v5 = vmul.f32 %v708_v61, %v630_v23  ;;  %v236_v20 = vmul.f32 %v708_v61, %v644_v30  ;;  %v745_v27 = vperm.slane %v126_v60, 6 }
  0xa3   :  { %v642_v29 = vadd.f32 %v451_v12, %v120_v26 }
  0xa4   :  { %v123_v28 = vpop.f32.mrf.mxu3 }
  0xa5   :  { %v646_v31 = vadd.f32 %v451_v12, %v123_v28  ;;  %v201_v33 = vrot.slane %v642_v29, 7  ;;  %v320_v42 = vrot.slane %v642_v29, 1  ;;  %v732_v12 = vperm.slane %v126_v60, 5 }
  0xa6   :  { %246 = vrot.lane.b32.xlu2 %v630_v23, %s561_s9 }
  0xa7   :  { %295 = vrot.lane.b32.xlu0 %v614_v14, %s561_s9  ;;  %333 = vrot.lane.b32.xlu1 %v633_v24, %s558_s27  ;;  %v203_v32 = vrot.slane %v646_v31, 7  ;;  %v202_v38 = vsel %vm197_vm1, %v199_v19, %v201_v33  ;;  %v322_v44 = vrot.slane %v646_v31, 1  ;;  %v321_v45 = vsel %vm316_vm2, %v318_v21, %v320_v42 }
  0xa8   :  { %v672_v40 = vsel %vm185_vm4, %v202_v38, 0.0  ;;  %v684_v47 = vsel %vm188_vm5, %v321_v45, 0.0 }
  0xa9   :  { %v657_v34 = vsel %vm197_vm1, %v201_v33, %v203_v32  ;;  %v328_v46 = vsel %vm316_vm2, %v322_v44, 0.0  ;;  %v691_v49 = vsel %vm316_vm2, %v320_v42, %v322_v44  ;;  %v356_v44 = vmul.f32 %v756_v36, %v684_v47 }
  0xaa   :  { %v686_v48 = vsel %vm190_vm6, %v328_v46, 0.0  ;;  %v239_v21 = vmul.f32 %v708_v61, %v657_v34 }
  0xae   :  { %244 = vrot.lane.b32.xlu2 %v644_v30, %s561_s9 }
  0xaf   :  { %269 = vrot.lane.b32.xlu1 %v642_v29, %s558_s27  ;;  %216 = vrot.lane.b32.xlu0 %v630_v23, %s558_s27 }
  0xb6   :  { %271 = vrot.lane.b32.xlu2 %v646_v31, %s558_s27 }
  0xb7   :  { %220 = vrot.lane.b32.xlu1 %v657_v34, %s558_s27  ;;  %214 = vrot.lane.b32.xlu0 %v644_v30, %s558_s27 }
  0xbe   :  { %299 = vrot.lane.b32.xlu2 %v642_v29, %s561_s9 }
  0xbf   :  { %250 = vrot.lane.b32.xlu1 %v657_v34, %s561_s9  ;;  %301 = vrot.lane.b32.xlu0 %v646_v31, %s561_s9 }
  0xc6   :  { %363 = vrot.lane.b32.xlu2 %v633_v24, %s561_s9 }
  0xc7   :  { %218 = vrot.lane.b32.xlu1 %v672_v40, %s558_s27  ;;  %248 = vrot.lane.b32.xlu0 %v672_v40, %s561_s9 }
  0xce   :  { %335 = vrot.lane.b32.xlu2 %v684_v47, %s558_s27 }
  0xcf   :  { %339 = vrot.lane.b32.xlu1 %v686_v48, %s558_s27  ;;  %337 = vrot.lane.b32.xlu0 %v691_v49, %s558_s27 }
  0xd6   :  { %369 = vrot.lane.b32.xlu2 %v686_v48, %s561_s9 }
  0xd7   :  { %367 = vrot.lane.b32.xlu1 %v691_v49, %s561_s9  ;;  %365 = vrot.lane.b32.xlu0 %v684_v47, %s561_s9 }
  0xf8   :  { %v266_v50 = vpop.permute.xlu2 %265 }
  0xf9   :  { %v273_v37 = vsel %vm191_vm8, %v266_v50, 0.0  ;;  %v287_v50 = vmul.f32 %v727_v8, %v614_v14 }
  0xfa   :  { %v278_v45 = vmul.f32 %v729_v9, %v273_v37 }
 0x100   :  { %v247_v51 = vpop.permute.xlu2 %246 }
 0x101   :  { %v253_v3 = vsel %vm192_vm7, %v247_v51, 0.0 }
 0x102   :  { %v258_v10 = vmul.f32 %v714_v0, %v253_v3 }
 0x108   :  { %v245_v52 = vpop.permute.xlu2 %244 }
 0x109   :  { %v252_v22 = vsel %vm192_vm7, %v245_v52, 0.0 }
 0x10a   :  { %v257_v38 = vmul.f32 %v714_v0, %v252_v22 }
 0x110   :  { %v272_v53 = vpop.permute.xlu2 %271 }
 0x111   :  { %v298_v54 = vpop.permute.xlu1 %297  ;;  %v268_v55 = vpop.permute.xlu0 %267  ;;  %v276_v3 = vsel %vm191_vm8, %v272_v53, 0.0 }
 0x112   :  { %v274_v7 = vsel %vm191_vm8, %v268_v55, 0.0  ;;  %v304_v17 = vsel %vm192_vm7, %v298_v54, 0.0  ;;  %v281_v14 = vmul.f32 %v729_v9, %v276_v3 }
 0x113   :  { %v279_v13 = vmul.f32 %v729_v9, %v274_v7  ;;  %v309_v32 = vmul.f32 %v732_v12, %v304_v17 }
 0x118   :  { %v703_v56 = vpop.permute.xlu2 %299 }
 0x119   :  { %v296_v57 = vpop.permute.xlu0 %295  ;;  %v334_v58 = vpop.permute.xlu1 %333 }
 0x11a   :  { %v303_v52 = vsel %vm192_vm7, %v296_v57, 0.0  ;;  %v341_v47 = vsel %vm191_vm8, %v334_v58, 0.0 }
 0x11b   :  { %v346_v7 = vmul.f32 %v745_v27, %v341_v47 }
 0x120   :  { %v364_v63 = vpop.permute.xlu2 %363 }
 0x121   :  { %v716_v1 = vpop.permute.xlu1 %269  ;;  %v217_v2 = vpop.permute.xlu0 %216  ;;  %v371_v53 = vsel %vm192_vm7, %v364_v63, 0.0  ;;  %v453_v63 = vld [vmem:[%s838_s4] ss:$0 sm:$0xff]  ;;  %s562_s4 = smov [#allocation8]  }
 0x122   :  { %v223_v4 = vsel %vm191_vm8, %v217_v2, 0.0  ;;  %s400_s11 = sshll.u32 %s562_s4, 4  ;;  %s401_s11 = int_to_ptr.vmem [resolvable:$true] %s400_s11 }
 0x123   :  { %v228_v6 = vmul.f32 %v711_v62, %v223_v4 }
 0x125   :  { %v241_v11 = vadd.f32 %v237_v5, %v228_v6  ;;  %v308_v5 = vmul.f32 %v732_v12, %v303_v52  ;;  %v357_v52 = vmul.f32 %v756_v36, %v691_v49 }
 0x127   :  { %v262_v15 = vadd.f32 %v258_v10, %v241_v11  ;;  %v452_v10 = vld [vmem:[#allocation7 + $0x8] ss:$0 sm:$0xff] }
 0x128   :  { %v336_v19 = vpop.permute.xlu2 %335 }
 0x129   :  { %v283_v23 = vadd.f32 %v279_v13, %v262_v15  ;;  %v221_v25 = vpop.permute.xlu1 %220  ;;  %v215_v26 = vpop.permute.xlu0 %214  ;;  %v342_v16 = vsel %vm191_vm8, %v336_v19, 0.0  ;;  %v355_v15 = vmul.f32 %v756_v36, %v633_v24  ;;  %v290_v19 = vmul.f32 %v727_v8, %v646_v31 }
 0x12a   :  { %v225_v28 = vsel %vm191_vm8, %v221_v25, 0.0  ;;  %v222_v30 = vsel %vm191_vm8, %v215_v26, 0.0  ;;  %v347_v42 = vmul.f32 %v745_v27, %v342_v16  ;;  %v238_v31 = vmul.f32 %v708_v61, %v672_v40 }
 0x12b   :  { %v230_v33 = vmul.f32 %v711_v62, %v225_v28  ;;  %v292_v34 = vadd.f32 %v288_v18, %v283_v23  ;;  %v227_v35 = vmul.f32 %v711_v62, %v222_v30  ;;  %v305_v40 = vsel %vm192_vm7, %v703_v56, 0.0 }
 0x12d   :  { %v243_v39 = vadd.f32 %v239_v21, %v230_v33  ;;  %v313_v41 = vadd.f32 %v309_v32, %v292_v34  ;;  %v240_v43 = vadd.f32 %v236_v20, %v227_v35  ;;  %v376_v20 = vmul.f32 %v452_v10, %v371_v53 }
 0x12e   :  { %v275_v33 = vsel %vm191_vm8, %v716_v1, 0.0 }
 0x12f   :  { %v351_v46 = vadd.f32 %v347_v42, %v313_v41  ;;  %v261_v51 = vadd.f32 %v257_v38, %v240_v43  ;;  %v280_v38 = vmul.f32 %v729_v9, %v275_v33  ;;  %v289_v42 = vmul.f32 %v727_v8, %v642_v29 }
 0x130   :  { %v370_v61 = vpop.permute.xlu2 %369  ;;  %v310_v9 = vmul.f32 %v732_v12, %v305_v40 }
 0x131   :  { %v282_v54 = vadd.f32 %v278_v45, %v261_v51  ;;  %v251_v55 = vpop.permute.xlu1 %250  ;;  %v302_v60 = vpop.permute.xlu0 %301  ;;  %v769_v2 = vadd.f32 %v356_v44, %v351_v46  ;;  %v374_v56 = vsel %vm192_vm7, %v370_v61, 0.0  ;;  %v358_v46 = vmul.f32 %v756_v36, %v686_v48 }
 0x132   :  { %v255_v4 = vsel %vm192_vm7, %v251_v55, 0.0  ;;  %v306_v58 = vsel %vm192_vm7, %v302_v60, 0.0 }
 0x133   :  { %v291_v57 = vadd.f32 %v287_v50, %v282_v54  ;;  %v260_v6 = vmul.f32 %v714_v0, %v255_v4  ;;  %v311_v23 = vmul.f32 %v732_v12, %v306_v58  ;;  %v379_v50 = vmul.f32 %v452_v10, %v374_v56 }
 0x135   :  { %v312_v11 = vadd.f32 %v308_v5, %v291_v57  ;;  %v264_v13 = vadd.f32 %v260_v6, %v243_v39 }
 0x137   :  { %v350_v17 = vadd.f32 %v346_v7, %v312_v11  ;;  %v285_v18 = vadd.f32 %v281_v14, %v264_v13 }
 0x139   :  { %v359_v21 = vadd.f32 %v355_v15, %v350_v17  ;;  %v294_v22 = vadd.f32 %v290_v19, %v285_v18  ;;  %v219_v25 = vpop.permute.xlu1 %218  ;;  %v249_v26 = vpop.permute.xlu0 %248 }
 0x13a   :  { %v224_v28 = vsel %vm191_vm8, %v219_v25, 0.0  ;;  %v254_v24 = vsel %vm192_vm7, %v249_v26, 0.0 }
 0x13b   :  { %v315_v16 = vadd.f32 %v311_v23, %v294_v22  ;;  %v229_v30 = vmul.f32 %v711_v62, %v224_v28  ;;  %v380_v32 = vadd.f32 %v376_v20, %v359_v21  ;;  %v259_v35 = vmul.f32 %v714_v0, %v254_v24 }
 0x13d   :  { %v242_v34 = vadd.f32 %v238_v31, %v229_v30  ;;  %v388_v37 = vadd.f32 %v453_v63, %v380_v32 }
 0x13f   :  { %v263_v39 = vadd.f32 %v259_v35, %v242_v34  ;;  %392 = vst [vmem:[#allocation8] sm:$0xff] %v388_v37 }
 0x141   :  { %v284_v41 = vadd.f32 %v280_v38, %v263_v39  ;;  %v340_v62 = vpop.permute.xlu1 %339  ;;  %v338_v43 = vpop.permute.xlu0 %337 }
 0x142   :  { %v344_v1 = vsel %vm191_vm8, %v340_v62, 0.0  ;;  %v343_v0 = vsel %vm191_vm8, %v338_v43, 0.0 }
 0x143   :  { %v349_v44 = vmul.f32 %v745_v27, %v344_v1  ;;  %v293_v45 = vadd.f32 %v289_v42, %v284_v41  ;;  %v348_v8 = vmul.f32 %v745_v27, %v343_v0 }
 0x145   :  { %v353_v51 = vadd.f32 %v349_v44, %v315_v16  ;;  %v314_v29 = vadd.f32 %v310_v9, %v293_v45 }
 0x147   :  { %v362_v54 = vadd.f32 %v358_v46, %v353_v51  ;;  %v352_v55 = vadd.f32 %v348_v8, %v314_v29 }
 0x149   :  { %v383_v12 = vadd.f32 %v379_v50, %v362_v54  ;;  %v368_v60 = vpop.permute.xlu1 %367  ;;  %v361_v3 = vadd.f32 %v357_v52, %v352_v55  ;;  %v366_v47 = vpop.permute.xlu0 %365 }
 0x14a   :  { %v373_v4 = vsel %vm192_vm7, %v368_v60, 0.0  ;;  %v372_v48 = vsel %vm192_vm7, %v366_v47, 0.0 }
 0x14b   :  { %v391_v5 = vadd.f32 %v453_v63, %v383_v12  ;;  %v378_v57 = vmul.f32 %v452_v10, %v373_v4  ;;  %v377_v6 = vmul.f32 %v452_v10, %v372_v48 }
 0x14d   :  { %395 = vst [vmem:[#allocation8 + $0x18] sm:$0xff] %v391_v5  ;;  %v382_v27 = vadd.f32 %v378_v57, %v361_v3  ;;  %v381_v49 = vadd.f32 %v377_v6, %v769_v2 }
 0x14f   :  { %v390_v36 = vadd.f32 %v453_v63, %v382_v27  ;;  %v389_v14 = vadd.f32 %v453_v63, %v381_v49 }
 0x151   :  { %394 = vst [vmem:[#allocation8 + $0x10] sm:$0xff] %v390_v36 }
 0x152   :  { %393 = vst [vmem:[#allocation8 + $0x8] sm:$0xff] %v389_v14 }
 0x153   :  { %408 = dma.vmem_to_hbm [thread:$0]  %s401_s11, 512, %s403_s14, [#allocation4], %s557_s26, %s557_s26, %s558_s27  }
 0x154   :  { %554 = dma.done.wait [#allocation4], 512  }
 0x155   :  { %555 = vsyncadd [#allocation4], 4294966784 }
 0x156   :  { %413 = vsyncpa [#allocation3], 1 }
 0x157   :  { %414 = vsyncpa [#allocation6], 1 }
 0x158   :  { %415 = vsyncpa [#allocation4], 1 }

</bundles_post_ra>
